<compile_context>
chip_gen: v7x
topology: tpu7x:2x2x1
jax: 0.10.0
libtpu: 0.0.40
codegen_flags: <defaults>
</compile_context>

<pallas_src>
import functools

import jax
import jax.numpy as jnp
from jax.experimental import pallas as pl
from jax.experimental.pallas import tpu as pltpu


def se_block_kernel(x_ref, w1_ref, w2_ref, o_ref, *, channels_last):
    # x_ref:  (Bb, HW, C) if channels_last else (Bb, C, HW)
    # w1_ref: (C, C//r)   w2_ref: (C//r, C)   (transposed torch weights)
    x = x_ref[...]
    spatial_axis = 1 if channels_last else 2

    # --- squeeze: global average pool over the spatial axis (f32 accumulate)
    y = jnp.mean(x.astype(jnp.float32), axis=spatial_axis)          # (Bb, C)

    # --- excitation: FC -> ReLU -> FC -> Sigmoid (M = Bb on the MXU)
    h = jnp.dot(y, w1_ref[...], preferred_element_type=jnp.float32)  # (Bb, hid)
    h = jnp.maximum(h, 0.0)
    s = jax.nn.sigmoid(
        jnp.dot(h, w2_ref[...], preferred_element_type=jnp.float32)) # (Bb, C)
    s = s.astype(x.dtype)

    # --- scale: broadcast the channel gate over the spatial axis
    if channels_last:
        o_ref[...] = x * s[:, None, :]
    else:
        o_ref[...] = x * s[:, :, None]


def _pick_block_batch(B, bytes_per_batch, target_bytes):
    """Largest divisor of B whose block stays under `target_bytes` while
    keeping at least 2 grid steps (so v7x's two TensorCores both get work)."""
    best = 1
    for bb in range(1, B + 1):
        if B % bb:
            continue
        steps = B // bb
        if bb * bytes_per_batch <= target_bytes and (steps >= 2 or B == 1):
            best = bb
    return best


def se_block(x, w1_t, w2_t, *, target_block_bytes=2 << 20):
    """x: (B, C, H, W).  w1_t: (C, C//r), w2_t: (C//r, C)."""
    B, C, H, W = x.shape
    HW = H * W
    hid = w1_t.shape[1]
    assert w1_t.shape == (C, hid) and w2_t.shape == (hid, C)

    # Keep the lane (last) axis a multiple of 128 whenever possible.
    channels_last = (HW % 128 != 0) and (C % 128 == 0)
    if channels_last:
        # (B, C, H, W) -> (B, H*W, C): lane axis = C, spatial on sublanes.
        x_flat = x.transpose(0, 2, 3, 1).reshape(B, HW, C)
        block_tail = (HW, C)
    else:
        x_flat = x.reshape(B, C, HW)
        block_tail = (C, HW)

    itemsize = jnp.dtype(x.dtype).itemsize
    bytes_per_batch = C * HW * itemsize
    Bb = _pick_block_batch(B, bytes_per_batch, target_block_bytes)
    grid = (B // Bb,)

    # VMEM budget: double-buffered input + output blocks + weights + slack.
    block_bytes = Bb * bytes_per_batch
    weight_bytes = (w1_t.size * jnp.dtype(w1_t.dtype).itemsize
                    + w2_t.size * jnp.dtype(w2_t.dtype).itemsize)
    vmem_limit = 4 * block_bytes + 2 * weight_bytes + (2 << 20)
    vmem_limit = int(min(max(vmem_limit, 16 << 20), 64 << 20))

    idx_map = lambda b: (b, 0, 0)

    out_flat = pl.pallas_call(
        functools.partial(se_block_kernel, channels_last=channels_last),
        out_shape=jax.ShapeDtypeStruct(x_flat.shape, x.dtype),
        grid_spec=pltpu.PrefetchScalarGridSpec(
            num_scalar_prefetch=0,
            grid=grid,
            in_specs=[
                pl.BlockSpec((Bb,) + block_tail, idx_map),
                pl.BlockSpec(w1_t.shape, lambda b: (0, 0)),
                pl.BlockSpec(w2_t.shape, lambda b: (0, 0)),
            ],
            out_specs=pl.BlockSpec((Bb,) + block_tail, idx_map),
        ),
        input_output_aliases={0: 0},  # output reuses x_flat's HBM buffer
        compiler_params=pltpu.CompilerParams(
            dimension_semantics=("parallel",),
            vmem_limit_bytes=vmem_limit,
        ),
    )(x_flat, w1_t, w2_t)

    if channels_last:
        return out_flat.reshape(B, H, W, C).transpose(0, 3, 1, 2)
    return out_flat.reshape(B, C, H, W)


def se_block_reference(x, w1_t, w2_t):
    # pure-JAX reference matching the PyTorch forward
    y = jnp.mean(x, axis=(2, 3))                 # (B, C)
    h = jnp.maximum(y @ w1_t, 0.0)               # (B, C//r)
    s = jax.nn.sigmoid(h @ w2_t)                 # (B, C)
    return x * s[:, :, None, None]


if __name__ == "__main__":
    # SE_Block defaults: ch_in=128, reduction=16 -> hidden = 8
    B, C, H, W = 2, 128, 16, 16
    reduction = 16
    hid = C // reduction

    key = jax.random.PRNGKey(0)
    k_x, k_w1, k_w2, k_x2 = jax.random.split(key, 4)

    x = jax.random.normal(k_x, (B, C, H, W), dtype=jnp.float32)

    # torch.nn.Linear(C, hid).weight has shape (hid, C); we pass the transpose
    # (C, hid) so the kernel computes y @ W1. Same for the second linear.
    bound1 = 1.0 / (C ** 0.5)
    bound2 = 1.0 / (hid ** 0.5)
    w1_t = jax.random.uniform(k_w1, (C, hid), jnp.float32, -bound1, bound1)
    w2_t = jax.random.uniform(k_w2, (hid, C), jnp.float32, -bound2, bound2)

    # Compute references BEFORE the kernel (input 0 is donated via aliasing).
    ref = se_block_reference(x, w1_t, w2_t)
    out = jax.block_until_ready(se_block(x, w1_t, w2_t))
    assert out.shape == (B, C, H, W)
    assert jnp.allclose(out, ref, atol=1e-5, rtol=1e-5)

    # Second config exercises the channels-last path (H*W = 49 not a multiple
    # of 128 -> C becomes the lane axis, keeping stores lane-dense).
    x2 = jax.random.normal(k_x2, (B, C, 7, 7), dtype=jnp.float32)
    ref2 = se_block_reference(x2, w1_t, w2_t)
    out2 = jax.block_until_ready(se_block(x2, w1_t, w2_t))
    assert out2.shape == (B, C, 7, 7)
    assert jnp.allclose(out2, ref2, atol=1e-5, rtol=1e-5)

    print("KERNEL_OK")
</pallas_src>

<mosaic_0001>
module attributes {stable_mosaic.version = 11 : i64} {
  func.func @se_block_kernel(%arg0: i32, %arg1: memref<1x128x256xf32, #tpu.memory_space<vmem>>, %arg2: memref<128x8xf32, #tpu.memory_space<vmem>>, %arg3: memref<8x128xf32, #tpu.memory_space<vmem>>, %arg4: memref<1x128x256xf32, #tpu.memory_space<vmem>>) attributes {dimension_semantics = [#tpu.dimension_semantics<parallel>], iteration_bounds = array<i64: 2>, scalar_prefetch = 0 : i64, scratch_operands = 0 : i64, tpu.core_type = #tpu.core_type<tc>, window_params = [{transform_indices = @transform_0, window_bounds = array<i64: 1, 128, 256>}, {pipeline_mode = #tpu.pipeline_mode<synchronous>, transform_indices = @transform_1, window_bounds = array<i64: 128, 8>}, {pipeline_mode = #tpu.pipeline_mode<synchronous>, transform_indices = @transform_2, window_bounds = array<i64: 8, 128>}, {transform_indices = @transform_3, window_bounds = array<i64: 1, 128, 256>}]} {
    %c0 = arith.constant 0 : index
    %c0_0 = arith.constant 0 : index
    %c0_1 = arith.constant 0 : index
    %0 = vector.load %arg1[%c0, %c0_0, %c0_1] : memref<1x128x256xf32, #tpu.memory_space<vmem>>, vector<1x128x256xf32>
    %cst = arith.constant dense<0.000000e+00> : vector<1x128xf32>
    %1 = vector.multi_reduction <add>, %0, %cst [2] : vector<1x128x256xf32> to vector<1x128xf32>
    %cst_2 = arith.constant 2.560000e+02 : f32
    %2 = vector.broadcast %cst_2 : f32 to vector<1x128xf32>
    %3 = arith.divf %1, %2 : vector<1x128xf32>
    %c0_3 = arith.constant 0 : index
    %c0_4 = arith.constant 0 : index
    %4 = vector.load %arg2[%c0_3, %c0_4] : memref<128x8xf32, #tpu.memory_space<vmem>>, vector<128x8xf32>
    %cst_5 = arith.constant dense<0.000000e+00> : vector<1x8xf32>
    %5 = tpu.matmul %3, %4, %cst_5 {dimension_numbers = #tpu.dot_dimension_numbers<[1], [0], [0], [1], [0, 0, 1, 1], [], []>} : vector<1x128xf32>, vector<128x8xf32>, vector<1x8xf32> -> vector<1x8xf32>
    %cst_6 = arith.constant 0.000000e+00 : f32
    %6 = vector.broadcast %cst_6 : f32 to vector<1x8xf32>
    %7 = arith.maximumf %5, %6 : vector<1x8xf32>
    %c0_7 = arith.constant 0 : index
    %c0_8 = arith.constant 0 : index
    %8 = vector.load %arg3[%c0_7, %c0_8] : memref<8x128xf32, #tpu.memory_space<vmem>>, vector<8x128xf32>
    %cst_9 = arith.constant dense<0.000000e+00> : vector<1x128xf32>
    %9 = tpu.matmul %7, %8, %cst_9 {dimension_numbers = #tpu.dot_dimension_numbers<[1], [0], [0], [1], [0, 0, 1, 1], [], []>} : vector<1x8xf32>, vector<8x128xf32>, vector<1x128xf32> -> vector<1x128xf32>
    %10 = arith.negf %9 : vector<1x128xf32>
    %11 = math.exp %10 : vector<1x128xf32>
    %cst_10 = arith.constant 1.000000e+00 : f32
    %12 = vector.broadcast %cst_10 : f32 to vector<1x128xf32>
    %13 = arith.addf %12, %11 : vector<1x128xf32>
    %14 = arith.divf %12, %13 : vector<1x128xf32>
    %15 = vector.shape_cast %14 : vector<1x128xf32> to vector<1x128x1xf32>
    %16 = vector.broadcast %15 : vector<1x128x1xf32> to vector<1x128x256xf32>
    %17 = arith.mulf %0, %16 : vector<1x128x256xf32>
    %c0_11 = arith.constant 0 : index
    %c0_12 = arith.constant 0 : index
    %c0_13 = arith.constant 0 : index
    %18 = vector.load %arg4[%c0_11, %c0_12, %c0_13] : memref<1x128x256xf32, #tpu.memory_space<vmem>>, vector<1x128x256xf32>
    tpu.vector_store %arg4[%c0_11, %c0_12, %c0_13], %17 {strides = array<i32>} : memref<1x128x256xf32, #tpu.memory_space<vmem>>, vector<1x128x256xf32>,
    return
  }
  func.func @transform_0(%arg0: i32) -> (i32, i32, i32) {
    %c0_i32 = arith.constant 0 : i32
    %c0_i32_0 = arith.constant 0 : i32
    %c0_i32_1 = arith.constant 0 : i32
    return %arg0, %c0_i32, %c0_i32_0 : i32, i32, i32
  }
  func.func @transform_1(%arg0: i32) -> (i32, i32) {
    %c0_i32 = arith.constant 0 : i32
    %c0_i32_0 = arith.constant 0 : i32
    %c0_i32_1 = arith.constant 0 : i32
    return %c0_i32, %c0_i32_0 : i32, i32
  }
  func.func @transform_2(%arg0: i32) -> (i32, i32) {
    %c0_i32 = arith.constant 0 : i32
    %c0_i32_0 = arith.constant 0 : i32
    %c0_i32_1 = arith.constant 0 : i32
    return %c0_i32, %c0_i32_0 : i32, i32
  }
  func.func @transform_3(%arg0: i32) -> (i32, i32, i32) {
    %c0_i32 = arith.constant 0 : i32
    %c0_i32_0 = arith.constant 0 : i32
    %c0_i32_1 = arith.constant 0 : i32
    return %arg0, %c0_i32, %c0_i32_0 : i32, i32, i32
  }
}

</mosaic_0001>

<bundles_post_ra>
// kernel: tpu_custom_call.1
= control target key start
LH: loop header
LB: loop body
LE: loop exit
PB: predicated region body
PF: predicated region fallthrough
CT: control target
= control target key end

     0   :  { %8 = vsyncpa [#allocation3], 0  ;;  %s1537_s0 = inlined_call_operand.hbm [shape: f32[2,128,256], index: 0, kind: input, shape index: {}, may-alias: {0,3}]   ;;  %s1538_s1 = inlined_call_operand.vmem [shape: f32[128,8], index: 1, kind: input, shape index: {}]   ;;  %s1539_s2 = inlined_call_operand.vmem [shape: f32[8,128], index: 2, kind: input, shape index: {}]   ;;  %s1540_s3 = inlined_call_operand.hbm [shape: f32[2,128,256], index: 3, kind: output, shape index: {}, may-alias: {0,3}]  }
   0x1   :  { %10 = vsyncpa [#allocation3 + $0x1], 0 }
   0x2   :  { %11 = vsyncpa [#allocation4], 0 }
   0x3   :  { %13 = vsyncpa [#allocation4 + $0x1], 0  ;;  %s1085_s12 = smov 0   ;;  %s1087_s13 = smov 0  }
   0x4   :  { %s1089_s14 = smov 0   ;;  %s1091_s15 = smov 0  }
   0x5 LB: > { %s1106_s16 = sadd.s32 4294967295, %s1054_s15   ;;  %s800_s17 = sadd.s32 4294967294, %s1054_s15   ;;  %s1054_s15 = sphi %s1091_s15, %s1553_s15   ;;  %s1050_s14 = sphi %s1089_s14, %s1552_s14   ;;  %s1046_s13 = sphi %s1087_s13, %s1551_s13   ;;  %s1042_s12 = sphi %s1085_s12, %s1550_s12  }
   0x6   : > { %s1110_s18 = sadd.s32 1, %s1054_s15   ;;  %s26_s19 = sadd.s32 1, %s1050_s14 }
   0x7   : > { %s23_s20 = ssub.s32 %s1054_s15, %s1110_s18  ;;  %p33_p0 = scmp.ne.s32.totalorder %s1050_s14, %s1046_s13 }
   0x8   : > { %p24_p1 = scmp.eq.s32.totalorder %s23_s20, 0  ;;  %p34_p2 = scmp.eq.s32.totalorder %s1054_s15, 0 }
   0x9   : > { %p39_p3 = scmp.ne.s32.totalorder %s1046_s13, %s1042_s12  ;;  %p40_p4 = scmp.eq.s32.totalorder %s1106_s16, 0 }
   0xa   : > { %s1122_s21 = scalar_select %p24_p1, %s1050_s14, %s26_s19  }
   0xb   : > { %p1124_p5 = por %p34_p2, %p33_p0  ;;  %p1128_p6 = por %p40_p4, %p39_p3 }
   0xc   : > { %p105_p7 = scmp.eq.s32.totalorder %s1106_s16, 1  ;;  %p111_p8 = scmp.eq.s32.totalorder %s800_s17, 1 }
   0xd   : > { %p913_p10 = scmp.lt.s32.totalorder %s1054_s15, 2  ;;  %s137_s26 = sand.u32 1, %s1050_s14  }
   0xe   : > { %p1135_p11 = por %p105_p7, %p33_p0  ;;  %p1139_p12 = por %p111_p8, %p39_p3 }
   0xf   : > { %s816_s27 = sshll.u32 %s1054_s15, 12  ;;  %s803_s28 = sshll.u32 %s137_s26, 8 }
  0x10   : > { %s1544_s24 = scalar_select %p1135_p11, 1, 0 }
  0x11   : > { %s1545_s25 = scalar_select %p1139_p12, 1, 0 }
  0x12   : > { %s1148_s4 = scalar_lea.hbm %s1537_s0, %s816_s27  ;;  %s141_s5 = scalar_lea.vmem [#allocation2], %s803_s28 }
  0x13   : > { %s148_s6 = sshll.u32 %s141_s5, 4  ;;  %p1152_p13 = pnand %p913_p10, %p1124_p5  ;;  %s1156_s6 = int_to_ptr.vmem [resolvable:$true] %s148_s6 }
  0x14   : > { %s1158_s8 = scalar_lea.sflag [#allocation3], %s137_s26  ;;  %s958_s9 = scalar_lea.hbm %s1148_s4, 4096 }
  0x15   : > { %p959_p0 = scmp.ne.s32.totalorder %s1148_s4, %s958_s9  ;;  %p960_p1 = pneg %p1152_p13 }
  0x16   : > { %s963_s17 = scalar_lea.hbm %s1537_s0, 8192  ;;  %p964_p4 = scmp.lt.u32.totalorder %s1148_s4, %s1537_s0 }
  0x17   : > { %p961_p2 = pnand %p960_p1, %p959_p0  ;;  %p965_p5 = scmp.lt.u32.totalorder %s963_s17, %s958_s9 }
  0x18   : > { %p967_p8 = scmp.lt.u32.totalorder %s958_s9, %s1148_s4 }
  0x19   : > { %p962_p3 = pneg %p961_p2  ;;  %p966_p7 = por %p965_p5, %p964_p4 }
  0x1b   : > { %p968_p10 = por %p967_p8, %p966_p7 }
  0x1d   : > { %p969_p9 = pnand %p968_p10, %p962_p3 }
  0x1f   : > { %972 = shalt.err (!%p969_p9)
}
  0x20   : > { %s973_s22 = scalar_lea.vmem %s1156_s6, 4096  ;;  %s1056_s26 = smov [#allocation2]  }
  0x21   : > { %p974_p0 = scmp.ne.s32.totalorder %s1156_s6, %s973_s22  ;;  %s978_s27 = sshll.u32 %s1056_s26, 4  ;;  %s979_s27 = int_to_ptr.vmem [resolvable:$false] %s978_s27 }
  0x22   : > { %s980_s28 = scalar_lea.vmem %s979_s27, 8192  ;;  %p981_p11 = scmp.lt.s32.totalorder %s1156_s6, %s979_s27 }
  0x23   : > { %p976_p2 = pnand %p974_p0, %p960_p1  ;;  %p982_p4 = scmp.lt.s32.totalorder %s980_s28, %s973_s22 }
  0x25   : > { %p977_p12 = pneg %p976_p2  ;;  %p983_p5 = por %p982_p4, %p981_p11 }
  0x27   : > { %p984_p7 = pnand %p983_p5, %p977_p12 }
  0x29   : > { %987 = shalt.err (!%p984_p7)
}
  0x2a   : > { %s1057_s29 = smov 256   ;;  %s1058_s30 = smov 16  }
  0x2b   : > { %908 = dma.hbm_to_vmem [thread:$0]  (!%p1152_p13), %s1148_s4, 4096, %s1156_s6, %s1158_s8, %s1057_s29, %s1057_s29, %s1058_s30  }
  0x2c   : > { %p806_p9 = scmp.ge.s32.totalorder %s1054_s15, 1  ;;  %p156_p1 = scmp.lt.s32.totalorder %s1054_s15, 3 }
  0x2e   : > { %p157_p3 = pnand %p806_p9, %p156_p1 }
  0x2f   : > { %s1189_s5 = sand.u32 (!%p157_p3), 1, %s1046_s13  }
  0x30   : > { %160 = sbr.rel (%p157_p3) target bundleno = 853 (0x355), region = 32  ;;  %s807_s9 = sshll.u32 (!%p157_p3), %s1189_s5, 8 }
  0x31   : > { %s163_s10 = scalar_lea.sflag (!%p157_p3), [#allocation3], %s1189_s5  ;;  %s1195_s11 = scalar_lea.vmem (!%p157_p3), [#allocation2], %s807_s9 }
  0x37   : > { %1033 = dma.done.wait (%p1128_p6), %s163_s10, 4096  }
  0x38   : > { %1035 = vsyncadd (%p1128_p6), %s163_s10, 4294963200  ;;  %v1202_v0 = vld [vmem:[%s1195_s11] sm:$0xff]  ;;  %v1205_v1 = vld [vmem:[%s1195_s11 + $0x8] sm:$0xff]  ;;  %v1059_v38 = vmov 0.0|0.0   ;;  %vm1060_vm0 = vmmov 0   ;;  %vm329_vm1 = vcmask 130112  }
  0x39   : > { %v1208_v2 = vld [vmem:[%s1195_s11 + $0x20] sm:$0xff]  ;;  %v221_v3 = vadd.f32 %v1205_v1, %v1202_v0  ;;  %v1213_v4 = vld [vmem:[%s1195_s11 + $0x28] sm:$0xff]  ;;  %v1216_v5 = vld [vmem:[%s1195_s11 + $0x10] sm:$0xff]  ;;  %877 = vmatprep.subr.bf16.mxu0 %v1059_v38  ;;  %vm336_vm2 = vcmask 195712   ;;  %vm343_vm3 = vcmask 261312   ;;  %vm350_vm4 = vcmask 326912  }
  0x3a   : > { %v1219_v6 = vld [vmem:[%s1195_s11 + $0x18] sm:$0xff]  ;;  %v227_v7 = vadd.f32 %v1213_v4, %v1208_v2  ;;  %v1224_v8 = vld [vmem:[%s1195_s11 + $0x30] sm:$0xff]  ;;  %v1234_v12 = vld [vmem:[%s1195_s11 + $0x40] sm:$0xff]  ;;  %vm357_vm5 = vcmask 392512   ;;  %vm364_vm6 = vcmask 458112   ;;  %vm371_vm7 = vcmask 523712  }
  0x3b   : > { %v1227_v9 = vld [vmem:[%s1195_s11 + $0x38] sm:$0xff]  ;;  %222 = vadd.xlane.f32.xlu0 %v221_v3  ;;  %v224_v10 = vadd.f32 %v1219_v6, %v1216_v5  ;;  %v1237_v13 = vld [vmem:[%s1195_s11 + $0x48] sm:$0xff]  ;;  %v1240_v14 = vld [vmem:[%s1195_s11 + $0x50] sm:$0xff]  ;;  %vm378_vm8 = vcmask 589312   ;;  %vm385_vm9 = vcmask 654912   ;;  %vm392_vm10 = vcmask 720512  }
  0x3c   : > { %228 = vadd.xlane.f32.xlu1 %v227_v7  ;;  %v230_v11 = vadd.f32 %v1227_v9, %v1224_v8  ;;  %v1243_v15 = vld [vmem:[%s1195_s11 + $0x58] sm:$0xff]  ;;  %v233_v16 = vadd.f32 %v1237_v13, %v1234_v12  ;;  %v1250_v18 = vld [vmem:[%s1195_s11 + $0x60] sm:$0xff]  ;;  %v1253_v19 = vld [vmem:[%s1195_s11 + $0x68] sm:$0xff]  ;;  %vm399_vm11 = vcmask 786112   ;;  %vm406_vm12 = vcmask 851712   ;;  %s1424_s6 = scalar_lea.vmem [#allocation5], %s807_s9 }
  0x3d   : > { %v236_v17 = vadd.f32 %v1243_v15, %v1240_v14  ;;  %v1256_v20 = vld [vmem:[%s1195_s11 + $0x70] sm:$0xff]  ;;  %v1259_v21 = vld [vmem:[%s1195_s11 + $0x78] sm:$0xff]  ;;  %v239_v22 = vadd.f32 %v1253_v19, %v1250_v18  ;;  %v1266_v24 = vld [vmem:[%s1195_s11 + $0x80] sm:$0xff]  ;;  %vm413_vm13 = vcmask 917312   ;;  %vm420_vm14 = vcmask 982912   ;;  %s817_s9 = sshll.u32 %s1106_s16, 12 }
  0x3e   : > { %v242_v23 = vadd.f32 %v1259_v21, %v1256_v20  ;;  %v1269_v25 = vld [vmem:[%s1195_s11 + $0x88] sm:$0xff]  ;;  %v1272_v26 = vld [vmem:[%s1195_s11 + $0x90] sm:$0xff]  ;;  %v1275_v27 = vld [vmem:[%s1195_s11 + $0x98] sm:$0xff]  ;;  %vm427_vm15 = vcmask 1048512   ;;  %s727_s7 = sshll.u32 %s1424_s6, 4  ;;  %s1487_s19 = scalar_lea.hbm %s1540_s3, %s817_s9  ;;  %s1489_s7 = int_to_ptr.vmem [resolvable:$true] %s727_s7 }
  0x3f   : > { %225 = vadd.xlane.f32.xlu0 %v224_v10  ;;  %v245_v28 = vadd.f32 %v1269_v25, %v1266_v24  ;;  %v248_v29 = vadd.f32 %v1275_v27, %v1272_v26  ;;  %v1282_v30 = vld [vmem:[%s1195_s11 + $0xa0] sm:$0xff]  ;;  %v1285_v31 = vld [vmem:[%s1195_s11 + $0xa8] sm:$0xff]  ;;  %v1288_v32 = vld [vmem:[%s1195_s11 + $0xb0] sm:$0xff]  ;;  %s714_s16 = scalar_lea.sflag [#allocation4], %s1189_s5  ;;  %s988_s20 = scalar_lea.vmem %s1489_s7, 4096 }
  0x40   : > { %231 = vadd.xlane.f32.xlu1 %v230_v11  ;;  %v1291_v33 = vld [vmem:[%s1195_s11 + $0xb8] sm:$0xff]  ;;  %v286_v34 = vld [vmem:[%s1538_s1] sm:$0xff]  ;;  %v287_v35 = vld [vmem:[%s1538_s1 + $0x8] sm:$0xff]  ;;  %v251_v37 = vadd.f32 %v1285_v31, %v1282_v30  ;;  %p989_p6 = scmp.ne.s32.totalorder %s1489_s7, %s988_s20  ;;  %p1547_p11 = scmp.ne.s32.totalorder %s1544_s24, 0 }
  0x41   : > { %v878_v36 = vpack.c.bf16 %v287_v35, %v286_v34  ;;  %v254_v39 = vadd.f32 %v1291_v33, %v1288_v32  ;;  %v1304_v40 = vld [vmem:[%s1195_s11 + $0xc0] sm:$0xff]  ;;  %v1307_v41 = vld [vmem:[%s1195_s11 + $0xc8] sm:$0xff]  ;;  %v1310_v42 = vld [vmem:[%s1195_s11 + $0xd0] sm:$0xff]  ;;  %v318_v34 = vlaneseq  ;;  %s1062_s22 = smov [#allocation5]  }
  0x42   : > { %v1313_v43 = vld [vmem:[%s1195_s11 + $0xd8] sm:$0xff]  ;;  %v288_v44 = vld [vmem:[%s1538_s1 + $0x10] sm:$0xff]  ;;  %v257_v47 = vadd.f32 %v1307_v41, %v1304_v40  ;;  %v1326_v49 = vld [vmem:[%s1195_s11 + $0xe0] sm:$0xff]  ;;  %p990_p12 = pnand %p989_p6, %p1547_p11  ;;  %s992_s26 = sshll.u32 %s1062_s22, 4  ;;  %s993_s26 = int_to_ptr.vmem [resolvable:$false] %s992_s26 }
  0x43   : > { %234 = vadd.xlane.f32.xlu0 %v233_v16  ;;  %879 = vmatpush3.bf16.msra.mxu0 %v878_v36  ;;  %v289_v45 = vld [vmem:[%s1538_s1 + $0x18] sm:$0xff]  ;;  %v260_v48 = vadd.f32 %v1313_v43, %v1310_v42  ;;  %v1329_v50 = vld [vmem:[%s1195_s11 + $0xe8] sm:$0xff]  ;;  %v1332_v51 = vld [vmem:[%s1195_s11 + $0xf0] sm:$0xff]  ;;  %v1377_v35 = vand.u32 127, %v318_v34  ;;  %v1379_v36 = vshrl.u32 %v318_v34, 7  ;;  %s994_s27 = scalar_lea.vmem %s993_s26, 8192  ;;  %p995_p8 = scmp.lt.s32.totalorder %s1489_s7, %s993_s26 }
  0x44   : > { %237 = vadd.xlane.f32.xlu1 %v236_v17  ;;  %880 = vmatprep.subr.bf16.mxu0 %v1059_v38  ;;  %v881_v46 = vpack.c.bf16 %v289_v45, %v288_v44  ;;  %v1335_v52 = vld [vmem:[%s1195_s11 + $0xf8] sm:$0xff]  ;;  %v290_v53 = vld [vmem:[%s1538_s1 + $0x20] sm:$0xff]  ;;  %v291_v54 = vld [vmem:[%s1538_s1 + $0x28] sm:$0xff]  ;;  %v263_v56 = vadd.f32 %v1329_v50, %v1326_v49  ;;  %p991_p13 = pneg %p990_p12  ;;  %p996_p10 = scmp.lt.s32.totalorder %s994_s27, %s988_s20 }
  0x45   : > { %v884_v55 = vpack.c.bf16 %v291_v54, %v290_v53  ;;  %v266_v57 = vadd.f32 %v1335_v52, %v1332_v51  ;;  %v292_v58 = vld [vmem:[%s1538_s1 + $0x30] sm:$0xff]  ;;  %v293_v59 = vld [vmem:[%s1538_s1 + $0x38] sm:$0xff]  ;;  %v294_v61 = vld [vmem:[%s1538_s1 + $0x40] sm:$0xff]  ;;  %v338_v44 = vadd.s32 4294967272, %v1377_v35  ;;  %v345_v53 = vadd.s32 4294967264, %v1377_v35 }
  0x46   : > { %v887_v60 = vpack.c.bf16 %v293_v59, %v292_v58  ;;  %v295_v62 = vld [vmem:[%s1538_s1 + $0x48] sm:$0xff]  ;;  %v296_v3 = vld [vmem:[%s1538_s1 + $0x50] sm:$0xff]  ;;  %v297_v7 = vld [vmem:[%s1538_s1 + $0x58] sm:$0xff]  ;;  %v352_v58 = vadd.s32 4294967256, %v1377_v35  ;;  %p997_p0 = por %p996_p10, %p995_p8 }
  0x47   : > { %240 = vadd.xlane.f32.xlu0 %v239_v22  ;;  %882 = vmatpush3.bf16.msra.mxu0 %v881_v46  ;;  %v890_v63 = vpack.c.bf16 %v295_v62, %v294_v61  ;;  %v893_v10 = vpack.c.bf16 %v297_v7, %v296_v3  ;;  %v298_v11 = vld [vmem:[%s1538_s1 + $0x60] sm:$0xff]  ;;  %v299_v16 = vld [vmem:[%s1538_s1 + $0x68] sm:$0xff]  ;;  %v300_v22 = vld [vmem:[%s1538_s1 + $0x70] sm:$0xff]  ;;  %v322_v46 = vsub.s32 %v1377_v35, %v1379_v36  ;;  %v359_v7 = vadd.s32 4294967248, %v1377_v35 }
  0x48   : > { %243 = vadd.xlane.f32.xlu1 %v242_v23  ;;  %883 = vmatprep.subr.bf16.mxu0 %v1059_v38  ;;  %v896_v17 = vpack.c.bf16 %v299_v16, %v298_v11  ;;  %v301_v23 = vld [vmem:[%s1538_s1 + $0x78] sm:$0xff]  ;;  %v348_v3 = vsub.s32 %v345_v53, %v1379_v36  ;;  %v380_v53 = vadd.s32 4294967224, %v1377_v35  ;;  %p998_p2 = pnand %p997_p0, %p991_p13 }
  0x4b   : > { %246 = vadd.xlane.f32.xlu0 %v245_v28  ;;  %885 = vmatpush3.bf16.msra.mxu0 %v884_v55  ;;  %v899_v28 = vpack.c.bf16 %v301_v23, %v300_v22  ;;  %v366_v22 = vadd.s32 4294967240, %v1377_v35 }
  0x4c   : > { %249 = vadd.xlane.f32.xlu1 %v248_v29  ;;  %886 = vmatprep.subr.bf16.mxu0 %v1059_v38  ;;  %v1061_v29 = vmov 0.0  }
  0x4d   : > { %869 = vmatprep.mubr.msk.f32.mxu0 %vm1060_vm0, %v1061_v29  ;;  %872 = vmatprep.subr.mxu1 %v1061_v29 }
  0x4e   : > { %874 = vmatprep.mubr.msk.f32.mxu1 %vm1060_vm0, %v1061_v29  ;;  %vm502_vm0 = vcmask 64512  }
  0x4f   : > { %252 = vadd.xlane.f32.xlu0 %v251_v37  ;;  %888 = vmatpush3.bf16.msra.mxu0 %v887_v60  ;;  %v324_v37 = vadd.s32 4294967288, %v1377_v35 }
  0x50   : > { %255 = vadd.xlane.f32.xlu1 %v254_v39  ;;  %889 = vmatprep.subr.bf16.mxu0 %v1059_v38  ;;  %v331_v39 = vadd.s32 4294967280, %v1377_v35 }
  0x52   : > { %v334_v54 = vsub.s32 %v331_v39, %v1379_v36 }
  0x53   : > { %258 = vadd.xlane.f32.xlu0 %v257_v47  ;;  %891 = vmatpush3.bf16.msra.mxu0 %v890_v63 }
  0x54   : > { %261 = vadd.xlane.f32.xlu1 %v260_v48  ;;  %892 = vmatprep.subr.bf16.mxu0 %v1059_v38  ;;  %v327_v48 = vsub.s32 %v324_v37, %v1379_v36 }
  0x57   : > { %264 = vadd.xlane.f32.xlu0 %v263_v56  ;;  %894 = vmatpush3.bf16.msra.mxu0 %v893_v10 }
  0x58   : > { %267 = vadd.xlane.f32.xlu1 %v266_v57  ;;  %895 = vmatprep.subr.bf16.mxu0 %v1059_v38  ;;  %v341_v57 = vsub.s32 %v338_v44, %v1379_v36  ;;  %v362_v44 = vsub.s32 %v359_v7, %v1379_v36  ;;  %v394_v7 = vadd.s32 4294967208, %v1377_v35 }
  0x5b   : > { %897 = vmatpush3.bf16.msra.mxu0 %v896_v17  ;;  %v355_v17 = vsub.s32 %v352_v58, %v1379_v36 }
  0x5c   : > { %898 = vmatprep.subr.bf16.mxu0 %v1059_v38 }
  0x5f   : > { %900 = vmatpush3.bf16.msra.mxu0 %v899_v28 }
  0xc8   : > { %v223_v38 = vpop.xlane.xlu0 %222 }
  0xc9   : > { %v229_v45 = vpop.xlane.xlu1 %228  ;;  %v270_v47 = vmul.f32 0.00390625, %v223_v38 }
  0xca   : > { %v272_v55 = vmul.f32 0.00390625, %v229_v45  ;;  %v373_v45 = vadd.s32 4294967232, %v1377_v35 }
  0xcb   : > { %v323_v62 = vrot.slane %v270_v47, %v322_v46 }
  0xcc   : > { %v226_v56 = vpop.xlane.xlu0 %225  ;;  %v335_v10 = vrot.slane %v272_v55, %v334_v54 }
  0xcd   : > { %v271_v59 = vmul.f32 0.00390625, %v226_v56  ;;  %v232_v60 = vpop.xlane.xlu1 %231 }
  0xce   : > { %v273_v61 = vmul.f32 0.00390625, %v232_v60  ;;  %v387_v60 = vadd.s32 4294967216, %v1377_v35 }
  0xcf   : > { %v328_v63 = vrot.slane %v271_v59, %v327_v48  ;;  %v369_v48 = vsub.s32 %v366_v22, %v1379_v36  ;;  %v376_v59 = vsub.s32 %v373_v45, %v1379_v36 }
  0xd0   : > { %v342_v11 = vrot.slane %v273_v61, %v341_v57  ;;  %v235_v16 = vpop.xlane.xlu0 %234 }
  0xd1   : > { %v330_v23 = vsel %vm329_vm1, %v328_v63, %v323_v62  ;;  %v274_v28 = vmul.f32 0.00390625, %v235_v16  ;;  %v238_v29 = vpop.xlane.xlu1 %237 }
  0xd2   : > { %v337_v34 = vsel %vm336_vm2, %v335_v10, %v330_v23  ;;  %v275_v37 = vmul.f32 0.00390625, %v238_v29  ;;  %v390_v23 = vsub.s32 %v387_v60, %v1379_v36 }
  0xd3   : > { %v344_v38 = vsel %vm343_vm3, %v342_v11, %v337_v34  ;;  %v349_v39 = vrot.slane %v274_v28, %v348_v3  ;;  %v383_v3 = vsub.s32 %v380_v53, %v1379_v36  ;;  %v401_v28 = vadd.s32 4294967200, %v1377_v35 }
  0xd4   : > { %v356_v46 = vrot.slane %v275_v37, %v355_v17  ;;  %v241_v47 = vpop.xlane.xlu0 %240 }
  0xd5   : > { %v351_v54 = vsel %vm350_vm4, %v349_v39, %v344_v38  ;;  %v276_v55 = vmul.f32 0.00390625, %v241_v47  ;;  %v244_v56 = vpop.xlane.xlu1 %243  ;;  %v397_v38 = vsub.s32 %v394_v7, %v1379_v36  ;;  %v408_v39 = vadd.s32 4294967192, %v1377_v35 }
  0xd6   : > { %v277_v57 = vmul.f32 0.00390625, %v244_v56  ;;  %v358_v61 = vsel %vm357_vm5, %v356_v46, %v351_v54  ;;  %v404_v53 = vsub.s32 %v401_v28, %v1379_v36  ;;  %v415_v54 = vadd.s32 4294967184, %v1377_v35 }
  0xd7   : > { %v363_v58 = vrot.slane %v276_v55, %v362_v44 }
  0xd8   : > { %v370_v62 = vrot.slane %v277_v57, %v369_v48  ;;  %v247_v63 = vpop.xlane.xlu0 %246  ;;  %v418_v7 = vsub.s32 %v415_v54, %v1379_v36 }
  0xd9   : > { %v365_v10 = vsel %vm364_vm6, %v363_v58, %v358_v61  ;;  %v278_v11 = vmul.f32 0.00390625, %v247_v63  ;;  %v250_v16 = vpop.xlane.xlu1 %249  ;;  %v411_v58 = vsub.s32 %v408_v39, %v1379_v36 }
  0xda   : > { %v279_v17 = vmul.f32 0.00390625, %v250_v16  ;;  %v372_v29 = vsel %vm371_vm7, %v370_v62, %v365_v10 }
  0xdb   : > { %v377_v22 = vrot.slane %v278_v11, %v376_v59  ;;  %v422_v59 = vadd.s32 4294967176, %v1377_v35 }
  0xdc   : > { %v384_v34 = vrot.slane %v279_v17, %v383_v3  ;;  %v253_v37 = vpop.xlane.xlu0 %252 }
  0xdd   : > { %v379_v44 = vsel %vm378_vm8, %v377_v22, %v372_v29  ;;  %v280_v45 = vmul.f32 0.00390625, %v253_v37  ;;  %v256_v46 = vpop.xlane.xlu1 %255  ;;  %v425_v17 = vsub.s32 %v422_v59, %v1379_v36 }
  0xde   : > { %v281_v47 = vmul.f32 0.00390625, %v256_v46  ;;  %v386_v55 = vsel %vm385_vm9, %v384_v34, %v379_v44  ;;  %v501_v44 = vld [vmem:[%s1539_s2] sm:$0xff] }
  0xdf   : > { %v391_v48 = vrot.slane %v280_v45, %v390_v23  ;;  %873 = vmatpush3.msra.mxu1 %v501_v44 }
  0xe0   : > { %v398_v56 = vrot.slane %v281_v47, %v397_v38  ;;  %v259_v57 = vpop.xlane.xlu0 %258 }
  0xe1   : > { %v393_v60 = vsel %vm392_vm10, %v391_v48, %v386_v55  ;;  %v282_v61 = vmul.f32 0.00390625, %v259_v57  ;;  %v262_v62 = vpop.xlane.xlu1 %261  ;;  %v584_v57 = vsub.s32 0, %v1379_v36 }
  0xe2   : > { %v283_v63 = vmul.f32 0.00390625, %v262_v62  ;;  %v400_v10 = vsel %vm399_vm11, %v398_v56, %v393_v60 }
  0xe3   : > { %v405_v3 = vrot.slane %v282_v61, %v404_v53 }
  0xe4   : > { %v412_v11 = vrot.slane %v283_v63, %v411_v58  ;;  %v265_v16 = vpop.xlane.xlu0 %264 }
  0xe5   : > { %v407_v22 = vsel %vm406_vm12, %v405_v3, %v400_v10  ;;  %v284_v23 = vmul.f32 0.00390625, %v265_v16  ;;  %v268_v28 = vpop.xlane.xlu1 %267 }
  0xe6   : > { %v285_v29 = vmul.f32 0.00390625, %v268_v28  ;;  %v414_v37 = vsel %vm413_vm13, %v412_v11, %v407_v22 }
  0xe7   : > { %v419_v35 = vrot.slane %v284_v23, %v418_v7 }
  0xe8   : > { %v426_v34 = vrot.slane %v285_v29, %v425_v17 }
  0xe9   : > { %v421_v38 = vsel %vm420_vm14, %v419_v35, %v414_v37 }
  0xea   : > { %v428_v39 = vsel %vm427_vm15, %v426_v34, %v421_v38 }
  0xeb   : > { %870 = vmatmul.mubr.f32.vlgmr.msra.gmra.mrb[0].mxu0 %v428_v39 }
 0x1be   : > { %v496_v45 = vpop.f32.mrb[0].mxu0 }
 0x1bf   : > { %v500_v46 = vmax.f32 %v496_v45, 0.0  ;;  %v871_v47 = vpop.f32.mrb[1].mxu0 }
 0x1c1   : > { %875 = vmatmul.mubr.msk.f32.vlgmr.msra.gmra.mrb[0].mxu1 %vm502_vm0, %v500_v46 }
 0x294   : > { %v572_v48 = vpop.f32.mrb[0].mxu1 }
 0x295   : > { %v810_v53 = vmul.f32 -1.442695, %v572_v48  ;;  %v876_v54 = vpop.f32.mrb[1].mxu1 }
 0x297   : > { %954 = vpow2.f32 %v810_v53 }
 0x2a1   : > { %v955_v55 = vpop.eup %954 }
 0x2a2   : > { %v579_v56 = vadd.f32 1.0, %v955_v55 }
 0x2a4   : > { %956 = vrcp.f32 %v579_v56 }
 0x2ae   : > { %v957_v58 = vpop.eup %956 }
 0x2af   : > { %v585_v59 = vrot.slane %v957_v58, %v584_v57 }
 0x2b1   : > { %591 = vbcast.lane.b32.xlu1 %v585_v59, 264  ;;  %587 = vbcast.lane.b32.xlu0 %v585_v59, 256 }
 0x2b5   : > { %595 = vbcast.lane.b32.xlu1 %v585_v59, 272  ;;  %603 = vbcast.lane.b32.xlu0 %v585_v59, 288 }
 0x2b9   : > { %599 = vbcast.lane.b32.xlu1 %v585_v59, 280  ;;  %611 = vbcast.lane.b32.xlu0 %v585_v59, 304 }
 0x2bd   : > { %607 = vbcast.lane.b32.xlu1 %v585_v59, 296  ;;  %619 = vbcast.lane.b32.xlu0 %v585_v59, 320 }
 0x2c1   : > { %615 = vbcast.lane.b32.xlu1 %v585_v59, 312  ;;  %627 = vbcast.lane.b32.xlu0 %v585_v59, 336 }
 0x2c5   : > { %623 = vbcast.lane.b32.xlu1 %v585_v59, 328  ;;  %635 = vbcast.lane.b32.xlu0 %v585_v59, 352 }
 0x2c9   : > { %631 = vbcast.lane.b32.xlu1 %v585_v59, 344  ;;  %643 = vbcast.lane.b32.xlu0 %v585_v59, 368 }
 0x2cd   : > { %639 = vbcast.lane.b32.xlu1 %v585_v59, 360 }
 0x2d1   : > { %647 = vbcast.lane.b32.xlu1 %v585_v59, 376 }
 0x323   : > { %v592_v36 = vpop.permute.xlu1 %591  ;;  %v588_v60 = vpop.permute.xlu0 %587 }
 0x324   : > { %v651_v61 = vmul.f32 %v592_v36, %v1216_v5  ;;  %v652_v62 = vmul.f32 %v592_v36, %v1219_v6  ;;  %v649_v63 = vmul.f32 %v588_v60, %v1202_v0  ;;  %v650_v3 = vmul.f32 %v588_v60, %v1205_v1 }
 0x326   : > { %683 = vst [vmem:[%s1424_s6 + $0x10] sm:$0xff] %v651_v61  ;;  %684 = vst [vmem:[%s1424_s6 + $0x18] sm:$0xff] %v652_v62 }
 0x327   : > { %681 = vst [vmem:[%s1424_s6] sm:$0xff] %v649_v63  ;;  %682 = vst [vmem:[%s1424_s6 + $0x8] sm:$0xff] %v650_v3  ;;  %v596_v5 = vpop.permute.xlu1 %595  ;;  %v604_v0 = vpop.permute.xlu0 %603 }
 0x328   : > { %v653_v1 = vmul.f32 %v596_v5, %v1208_v2  ;;  %v654_v6 = vmul.f32 %v596_v5, %v1213_v4  ;;  %v657_v7 = vmul.f32 %v604_v0, %v1234_v12  ;;  %v658_v10 = vmul.f32 %v604_v0, %v1237_v13 }
 0x32a   : > { %685 = vst [vmem:[%s1424_s6 + $0x20] sm:$0xff] %v653_v1  ;;  %686 = vst [vmem:[%s1424_s6 + $0x28] sm:$0xff] %v654_v6 }
 0x32b   : > { %689 = vst [vmem:[%s1424_s6 + $0x40] sm:$0xff] %v657_v7  ;;  %690 = vst [vmem:[%s1424_s6 + $0x48] sm:$0xff] %v658_v10  ;;  %v600_v11 = vpop.permute.xlu1 %599  ;;  %v612_v16 = vpop.permute.xlu0 %611 }
 0x32c   : > { %v655_v17 = vmul.f32 %v600_v11, %v1224_v8  ;;  %v656_v2 = vmul.f32 %v600_v11, %v1227_v9  ;;  %v661_v4 = vmul.f32 %v612_v16, %v1250_v18  ;;  %v662_v12 = vmul.f32 %v612_v16, %v1253_v19 }
 0x32e   : > { %687 = vst [vmem:[%s1424_s6 + $0x30] sm:$0xff] %v655_v17  ;;  %688 = vst [vmem:[%s1424_s6 + $0x38] sm:$0xff] %v656_v2 }
 0x32f   : > { %693 = vst [vmem:[%s1424_s6 + $0x60] sm:$0xff] %v661_v4  ;;  %694 = vst [vmem:[%s1424_s6 + $0x68] sm:$0xff] %v662_v12  ;;  %v608_v13 = vpop.permute.xlu1 %607  ;;  %v620_v22 = vpop.permute.xlu0 %619 }
 0x330   : > { %v659_v23 = vmul.f32 %v608_v13, %v1240_v14  ;;  %v660_v8 = vmul.f32 %v608_v13, %v1243_v15  ;;  %v665_v9 = vmul.f32 %v620_v22, %v1266_v24  ;;  %v666_v18 = vmul.f32 %v620_v22, %v1269_v25 }
 0x332   : > { %691 = vst [vmem:[%s1424_s6 + $0x50] sm:$0xff] %v659_v23  ;;  %692 = vst [vmem:[%s1424_s6 + $0x58] sm:$0xff] %v660_v8 }
 0x333   : > { %697 = vst [vmem:[%s1424_s6 + $0x80] sm:$0xff] %v665_v9  ;;  %698 = vst [vmem:[%s1424_s6 + $0x88] sm:$0xff] %v666_v18  ;;  %v616_v19 = vpop.permute.xlu1 %615  ;;  %v628_v28 = vpop.permute.xlu0 %627 }
 0x334   : > { %v663_v29 = vmul.f32 %v616_v19, %v1256_v20  ;;  %v664_v14 = vmul.f32 %v616_v19, %v1259_v21  ;;  %v669_v15 = vmul.f32 %v628_v28, %v1282_v30  ;;  %v670_v24 = vmul.f32 %v628_v28, %v1285_v31 }
 0x336   : > { %695 = vst [vmem:[%s1424_s6 + $0x70] sm:$0xff] %v663_v29  ;;  %696 = vst [vmem:[%s1424_s6 + $0x78] sm:$0xff] %v664_v14 }
 0x337   : > { %701 = vst [vmem:[%s1424_s6 + $0xa0] sm:$0xff] %v669_v15  ;;  %702 = vst [vmem:[%s1424_s6 + $0xa8] sm:$0xff] %v670_v24  ;;  %v624_v25 = vpop.permute.xlu1 %623  ;;  %v636_v35 = vpop.permute.xlu0 %635 }
 0x338   : > { %v667_v34 = vmul.f32 %v624_v25, %v1272_v26  ;;  %v668_v20 = vmul.f32 %v624_v25, %v1275_v27  ;;  %v673_v21 = vmul.f32 %v636_v35, %v1304_v40  ;;  %v674_v30 = vmul.f32 %v636_v35, %v1307_v41 }
 0x33a   : > { %699 = vst [vmem:[%s1424_s6 + $0x90] sm:$0xff] %v667_v34  ;;  %700 = vst [vmem:[%s1424_s6 + $0x98] sm:$0xff] %v668_v20 }
 0x33b   : > { %705 = vst [vmem:[%s1424_s6 + $0xc0] sm:$0xff] %v673_v21  ;;  %706 = vst [vmem:[%s1424_s6 + $0xc8] sm:$0xff] %v674_v30  ;;  %v632_v31 = vpop.permute.xlu1 %631  ;;  %v644_v37 = vpop.permute.xlu0 %643 }
 0x33c   : > { %v671_v26 = vmul.f32 %v632_v31, %v1288_v32  ;;  %v672_v38 = vmul.f32 %v632_v31, %v1291_v33  ;;  %v677_v27 = vmul.f32 %v644_v37, %v1326_v49  ;;  %v678_v40 = vmul.f32 %v644_v37, %v1329_v50 }
 0x33e   : > { %703 = vst [vmem:[%s1424_s6 + $0xb0] sm:$0xff] %v671_v26  ;;  %704 = vst [vmem:[%s1424_s6 + $0xb8] sm:$0xff] %v672_v38 }
 0x33f   : > { %709 = vst [vmem:[%s1424_s6 + $0xe0] sm:$0xff] %v677_v27  ;;  %710 = vst [vmem:[%s1424_s6 + $0xe8] sm:$0xff] %v678_v40  ;;  %v640_v41 = vpop.permute.xlu1 %639 }
 0x340   : > { %v675_v39 = vmul.f32 %v640_v41, %v1310_v42  ;;  %v676_v44 = vmul.f32 %v640_v41, %v1313_v43 }
 0x342   : > { %707 = vst [vmem:[%s1424_s6 + $0xd0] sm:$0xff] %v675_v39  ;;  %708 = vst [vmem:[%s1424_s6 + $0xd8] sm:$0xff] %v676_v44 }
 0x343   : > { %v648_v32 = vpop.permute.xlu1 %647 }
 0x344   : > { %v679_v33 = vmul.f32 %v648_v32, %v1332_v51  ;;  %v680_v42 = vmul.f32 %v648_v32, %v1335_v52 }
 0x346   : > { %711 = vst [vmem:[%s1424_s6 + $0xf0] sm:$0xff] %v679_v33  ;;  %712 = vst [vmem:[%s1424_s6 + $0xf8] sm:$0xff] %v680_v42 }
 0x347   : > { %1001 = shalt.err (!%p998_p2)
}
 0x348   : > { %s1002_s28 = scalar_lea.hbm %s1487_s19, 4096  ;;  %s1006_s10 = scalar_lea.hbm %s1540_s3, 8192 }
 0x349   : > { %p1003_p4 = scmp.ne.s32.totalorder %s1487_s19, %s1002_s28  ;;  %p1007_p9 = scmp.lt.u32.totalorder %s1487_s19, %s1540_s3 }
 0x34a   : > { %p1008_p1 = scmp.lt.u32.totalorder %s1006_s10, %s1002_s28  ;;  %p1010_p6 = scmp.lt.u32.totalorder %s1002_s28, %s1487_s19 }
 0x34b   : > { %p1004_p5 = pnand %p1003_p4, %p1547_p11 }
 0x34c   : > { %p1009_p3 = por %p1008_p1, %p1007_p9 }
 0x34d   : > { %p1005_p7 = pneg %p1004_p5 }
 0x34e   : > { %p1011_p12 = por %p1010_p6, %p1009_p3 }
 0x350   : > { %p1012_p13 = pnand %p1011_p12, %p1005_p7 }
 0x352   : > { %1015 = shalt.err (!%p1012_p13)
}
 0x353   : > { %s1063_s4 = smov 256   ;;  %s1064_s6 = smov 16  }
 0x354   : > { %903 = dma.vmem_to_hbm [thread:$0]  (%p1547_p11), %s1489_s7, 4096, %s1487_s19, %s714_s16, %s1063_s4, %s1063_s4, %s1064_s6  }
 0x355 PF: > { %s742_s9 = sand.u32 1, %s1042_s12   ;;  %p1548_p8 = scmp.ne.s32.totalorder %s1545_s25, 0 }
 0x356   : > { %p1549_p10 = scmp.ge.s32.totalorder %s1054_s15, 2  ;;  %s743_s8 = scalar_lea.sflag [#allocation4], %s742_s9 }
 0x358   : > { %p910_p0 = pnand %p1549_p10, %p1548_p8 }
 0x35a   : > { %1037 = dma.done.wait (!%p910_p0), %s743_s8, 4096  }
 0x35b   : > { %1039 = vsyncadd (!%p910_p0), %s743_s8, 4294963200  ;;  %p16_p2 = scmp.ge.s32.totalorder %s1110_s18, 4   ;;  %s1550_s12 = smov %s1046_s13 }
 0x35c   : > { %s1551_s13 = smov %s1050_s14  ;;  %s1552_s14 = smov %s1122_s21 }
 0x35d   : > { %s1553_s15 = smov %s1110_s18  ;;  %18 = sbr.rel (!%p16_p2) target bundleno = 5 (0x5), region = 77 }
 0x364   :  { %748 = vsyncpa [#allocation3], 1 }
 0x365   :  { %750 = vsyncpa [#allocation3 + $0x1], 1 }
 0x366   :  { %751 = vsyncpa [#allocation4], 1 }
 0x367   :  { %753 = vsyncpa [#allocation4 + $0x1], 1 }

</bundles_post_ra>
